<compile_context>
chip_gen: v7x
topology: tpu7x:2x2x1
jax: 0.10.0
libtpu: 0.0.40
codegen_flags: <defaults>
</compile_context>

<pallas_src>
import functools

import jax
import jax.numpy as jnp
from jax.experimental import pallas as pl
from jax.experimental.pallas import tpu as pltpu


def _round_up(x, m):
    return (x + m - 1) // m * m


# ----------------------------- Pallas kernel -------------------------------

def _ffn_kernel(x_ref, w1_ref, b1_ref, w2_ref, b2_ref, o_ref, acc_ref,
                *, matmul_dtype):
    """One (tm, Dp) output tile; grid axis 1 iterates over d_ff chunks.

    h_chunk = relu(x @ w1[:, chunk] + b1[chunk])      (first linear + ReLU)
    acc    += h_chunk @ w2[chunk, :]                  (second linear, reduced)
    out     = acc + b2                                (only on last chunk)
    """
    f = pl.program_id(1)

    @pl.when(f == 0)
    def _():
        acc_ref[...] = jnp.zeros_like(acc_ref)

    x = x_ref[...].astype(matmul_dtype)
    w1 = w1_ref[...].astype(matmul_dtype)
    h = jnp.dot(x, w1, preferred_element_type=jnp.float32) + b1_ref[...]
    h = jnp.maximum(h, 0.0)
    # TODO(synk): nn.Dropout is identity at inference (eval mode); no-op here.
    acc_ref[...] += jnp.dot(h.astype(matmul_dtype),
                            w2_ref[...].astype(matmul_dtype),
                            preferred_element_type=jnp.float32)

    @pl.when(f == pl.num_programs(1) - 1)
    def _():
        o_ref[...] = (acc_ref[...] + b2_ref[...]).astype(o_ref.dtype)


# ------------------------------ wrapper -------------------------------------

def ffn_forward(x, w1, b1, w2, b2, *, block_rows=256, block_ff=512,
                matmul_dtype=jnp.float32):
    """y = relu(x @ w1 + b1) @ w2 + b2, fused in one pallas_call.

    x: (..., d_model) float32. w1: (d_model, d_ff), b1: (d_ff,),
    w2: (d_ff, d_model), b2: (d_model,).
    """
    orig_shape = x.shape
    d_model = orig_shape[-1]
    d_ff = w1.shape[1]
    x2d = x.reshape(-1, d_model).astype(jnp.float32)
    M = x2d.shape[0]

    # Lane-dense padding of feature dims to multiples of 128 (exact w/ zeros).
    Dp = _round_up(d_model, 128)
    Fp = _round_up(d_ff, 128)

    # Row tile: big tiles amortize per-grid-step overhead; pad M so grid divides.
    tm = min(block_rows, _round_up(M, 8))
    Mp = _round_up(M, tm)

    # d_ff reduction tile (multiple of 128, or the full padded d_ff).
    tf = min(_round_up(block_ff, 128), Fp)
    Fp = _round_up(Fp, tf)

    xp = jnp.zeros((Mp, Dp), jnp.float32).at[:M, :d_model].set(x2d)
    w1p = jnp.zeros((Dp, Fp), jnp.float32).at[:d_model, :d_ff].set(w1)
    b1p = jnp.zeros((1, Fp), jnp.float32).at[:, :d_ff].set(b1.reshape(1, -1))
    w2p = jnp.zeros((Fp, Dp), jnp.float32).at[:d_ff, :d_model].set(w2)
    b2p = jnp.zeros((1, Dp), jnp.float32).at[:, :d_model].set(b2.reshape(1, -1))

    grid = (Mp // tm, Fp // tf)

    out = pl.pallas_call(
        functools.partial(_ffn_kernel, matmul_dtype=matmul_dtype),
        out_shape=jax.ShapeDtypeStruct((Mp, Dp), jnp.float32),
        grid=grid,
        in_specs=[
            pl.BlockSpec((tm, Dp), lambda i, f: (i, 0)),   # x rows (reused over f)
            pl.BlockSpec((Dp, tf), lambda i, f: (0, f)),   # w1 d_ff-chunk
            pl.BlockSpec((1, tf), lambda i, f: (0, f)),    # b1 chunk
            pl.BlockSpec((tf, Dp), lambda i, f: (f, 0)),   # w2 d_ff-chunk
            pl.BlockSpec((1, Dp), lambda i, f: (0, 0)),    # b2
        ],
        out_specs=pl.BlockSpec((tm, Dp), lambda i, f: (i, 0)),
        scratch_shapes=[pltpu.VMEM((tm, Dp), jnp.float32)],
        compiler_params=pltpu.CompilerParams(
            dimension_semantics=("parallel", "arbitrary"),
            vmem_limit_bytes=64 << 20),
    )(xp, w1p, b1p, w2p, b2p)

    return out[:M, :d_model].reshape(orig_shape)


# ------------------------------ params --------------------------------------

def init_ffn(key, d_model, d_ff):
    """nn.Linear-style init; weights stored (in, out) so the kernel does x @ w."""
    k1w, k1b, k2w, k2b = jax.random.split(key, 4)
    bound1 = 1.0 / (d_model ** 0.5)
    bound2 = 1.0 / (d_ff ** 0.5)
    return {
        "w1": jax.random.uniform(k1w, (d_model, d_ff), jnp.float32, -bound1, bound1),
        "b1": jax.random.uniform(k1b, (d_ff,), jnp.float32, -bound1, bound1),
        "w2": jax.random.uniform(k2w, (d_ff, d_model), jnp.float32, -bound2, bound2),
        "b2": jax.random.uniform(k2b, (d_model,), jnp.float32, -bound2, bound2),
    }


# -------------------------------- main ---------------------------------------

if __name__ == "__main__":
    B, S = 2, 8
    D_MODEL, D_FF = 32, 64

    key = jax.random.PRNGKey(0)
    kx, kp = jax.random.split(key)
    params = init_ffn(kp, D_MODEL, D_FF)
    x = jax.random.normal(kx, (B, S, D_MODEL), jnp.float32)

    y = ffn_forward(x, params["w1"], params["b1"], params["w2"], params["b2"])
    y = jax.block_until_ready(y)

    # Pure-JAX reference (dropout == identity in eval mode).
    ref = jnp.maximum(x @ params["w1"] + params["b1"], 0.0) @ params["w2"] + params["b2"]

    assert y.shape == (B, S, D_MODEL), y.shape
    assert y.dtype == jnp.float32
    assert bool(jnp.all(jnp.isfinite(y)))
    assert bool(jnp.allclose(y, ref, atol=1e-3, rtol=1e-3)), float(
        jnp.max(jnp.abs(y - ref)))
    print("KERNEL_OK")
</pallas_src>

<mosaic_0001>
module attributes {stable_mosaic.version = 11 : i64} {
  func.func @_ffn_kernel(%arg0: i32, %arg1: i32, %arg2: memref<16x128xf32, #tpu.memory_space<vmem>>, %arg3: memref<128x128xf32, #tpu.memory_space<vmem>>, %arg4: memref<1x128xf32, #tpu.memory_space<vmem>>, %arg5: memref<128x128xf32, #tpu.memory_space<vmem>>, %arg6: memref<1x128xf32, #tpu.memory_space<vmem>>, %arg7: memref<16x128xf32, #tpu.memory_space<vmem>>, %arg8: memref<16x128xf32, #tpu.memory_space<vmem>>) attributes {dimension_semantics = [#tpu.dimension_semantics<parallel>, #tpu.dimension_semantics<arbitrary>], iteration_bounds = array<i64: 1, 1>, scalar_prefetch = 0 : i64, scratch_operands = 1 : i64, tpu.core_type = #tpu.core_type<tc>, window_params = [{transform_indices = @transform_0, window_bounds = array<i64: 16, 128>}, {transform_indices = @transform_1, window_bounds = array<i64: 128, 128>}, {transform_indices = @transform_2, window_bounds = array<i64: 1, 128>}, {transform_indices = @transform_3, window_bounds = array<i64: 128, 128>}, {pipeline_mode = #tpu.pipeline_mode<synchronous>, transform_indices = @transform_4, window_bounds = array<i64: 1, 128>}, {transform_indices = @transform_5, window_bounds = array<i64: 16, 128>}]} {
    %c0_i32 = arith.constant 0 : i32
    %0 = arith.cmpi eq, %arg1, %c0_i32 : i32
    %1 = arith.extui %0 : i1 to i32
    %c0_i32_0 = arith.constant 0 : i32
    %2 = arith.cmpi ne, %1, %c0_i32_0 : i32
    scf.if %2 {
      %cst_16 = arith.constant 0.000000e+00 : f32
      %19 = vector.broadcast %cst_16 : f32 to vector<16x128xf32>
      %c0_17 = arith.constant 0 : index
      %c0_18 = arith.constant 0 : index
      %20 = vector.load %arg8[%c0_17, %c0_18] : memref<16x128xf32, #tpu.memory_space<vmem>>, vector<16x128xf32>
      tpu.vector_store %arg8[%c0_17, %c0_18], %19 {strides = array<i32>} : memref<16x128xf32, #tpu.memory_space<vmem>>, vector<16x128xf32>,
    } else {
    }
    %c0 = arith.constant 0 : index
    %c0_1 = arith.constant 0 : index
    %3 = vector.load %arg2[%c0, %c0_1] : memref<16x128xf32, #tpu.memory_space<vmem>>, vector<16x128xf32>
    %c0_2 = arith.constant 0 : index
    %c0_3 = arith.constant 0 : index
    %4 = vector.load %arg3[%c0_2, %c0_3] : memref<128x128xf32, #tpu.memory_space<vmem>>, vector<128x128xf32>
    %cst = arith.constant dense<0.000000e+00> : vector<16x128xf32>
    %5 = tpu.matmul %3, %4, %cst {dimension_numbers = #tpu.dot_dimension_numbers<[1], [0], [0], [1], [0, 0, 1, 1], [], []>} : vector<16x128xf32>, vector<128x128xf32>, vector<16x128xf32> -> vector<16x128xf32>
    %c0_4 = arith.constant 0 : index
    %c0_5 = arith.constant 0 : index
    %6 = vector.load %arg4[%c0_4, %c0_5] : memref<1x128xf32, #tpu.memory_space<vmem>>, vector<1x128xf32>
    %7 = vector.broadcast %6 : vector<1x128xf32> to vector<16x128xf32>
    %8 = arith.addf %5, %7 : vector<16x128xf32>
    %cst_6 = arith.constant 0.000000e+00 : f32
    %9 = vector.broadcast %cst_6 : f32 to vector<16x128xf32>
    %10 = arith.maximumf %8, %9 : vector<16x128xf32>
    %c0_7 = arith.constant 0 : index
    %c0_8 = arith.constant 0 : index
    %11 = vector.load %arg8[%c0_7, %c0_8] : memref<16x128xf32, #tpu.memory_space<vmem>>, vector<16x128xf32>
    %c0_9 = arith.constant 0 : index
    %c0_10 = arith.constant 0 : index
    %12 = vector.load %arg5[%c0_9, %c0_10] : memref<128x128xf32, #tpu.memory_space<vmem>>, vector<128x128xf32>
    %cst_11 = arith.constant dense<0.000000e+00> : vector<16x128xf32>
    %13 = tpu.matmul %10, %12, %cst_11 {dimension_numbers = #tpu.dot_dimension_numbers<[1], [0], [0], [1], [0, 0, 1, 1], [], []>} : vector<16x128xf32>, vector<128x128xf32>, vector<16x128xf32> -> vector<16x128xf32>
    %14 = arith.addf %11, %13 : vector<16x128xf32>
    %c0_12 = arith.constant 0 : index
    %c0_13 = arith.constant 0 : index
    %15 = vector.load %arg8[%c0_12, %c0_13] : memref<16x128xf32, #tpu.memory_space<vmem>>, vector<16x128xf32>
    tpu.vector_store %arg8[%c0_12, %c0_13], %14 {strides = array<i32>} : memref<16x128xf32, #tpu.memory_space<vmem>>, vector<16x128xf32>,
    %c0_i32_14 = arith.constant 0 : i32
    %16 = arith.cmpi eq, %arg1, %c0_i32_14 : i32
    %17 = arith.extui %16 : i1 to i32
    %c0_i32_15 = arith.constant 0 : i32
    %18 = arith.cmpi ne, %17, %c0_i32_15 : i32
    scf.if %18 {
      %c0_16 = arith.constant 0 : index
      %c0_17 = arith.constant 0 : index
      %19 = vector.load %arg8[%c0_16, %c0_17] : memref<16x128xf32, #tpu.memory_space<vmem>>, vector<16x128xf32>
      %c0_18 = arith.constant 0 : index
      %c0_19 = arith.constant 0 : index
      %20 = vector.load %arg6[%c0_18, %c0_19] : memref<1x128xf32, #tpu.memory_space<vmem>>, vector<1x128xf32>
      %21 = vector.broadcast %20 : vector<1x128xf32> to vector<16x128xf32>
      %22 = arith.addf %19, %21 : vector<16x128xf32>
      %c0_20 = arith.constant 0 : index
      %c0_21 = arith.constant 0 : index
      %23 = vector.load %arg7[%c0_20, %c0_21] : memref<16x128xf32, #tpu.memory_space<vmem>>, vector<16x128xf32>
      tpu.vector_store %arg7[%c0_20, %c0_21], %22 {strides = array<i32>} : memref<16x128xf32, #tpu.memory_space<vmem>>, vector<16x128xf32>,
    } else {
    }
    return
  }
  func.func @transform_0(%arg0: i32, %arg1: i32) -> (i32, i32) {
    %c0_i32 = arith.constant 0 : i32
    %c0_i32_0 = arith.constant 0 : i32
    return %arg0, %c0_i32 : i32, i32
  }
  func.func @transform_1(%arg0: i32, %arg1: i32) -> (i32, i32) {
    %c0_i32 = arith.constant 0 : i32
    %c0_i32_0 = arith.constant 0 : i32
    return %c0_i32, %arg1 : i32, i32
  }
  func.func @transform_2(%arg0: i32, %arg1: i32) -> (i32, i32) {
    %c0_i32 = arith.constant 0 : i32
    %c0_i32_0 = arith.constant 0 : i32
    return %c0_i32, %arg1 : i32, i32
  }
  func.func @transform_3(%arg0: i32, %arg1: i32) -> (i32, i32) {
    %c0_i32 = arith.constant 0 : i32
    %c0_i32_0 = arith.constant 0 : i32
    return %arg1, %c0_i32 : i32, i32
  }
  func.func @transform_4(%arg0: i32, %arg1: i32) -> (i32, i32) {
    %c0_i32 = arith.constant 0 : i32
    %c0_i32_0 = arith.constant 0 : i32
    %c0_i32_1 = arith.constant 0 : i32
    return %c0_i32, %c0_i32_0 : i32, i32
  }
  func.func @transform_5(%arg0: i32, %arg1: i32) -> (i32, i32) {
    %c0_i32 = arith.constant 0 : i32
    %c0_i32_0 = arith.constant 0 : i32
    return %arg0, %c0_i32 : i32, i32
  }
}

</mosaic_0001>

<bundles_post_ra>
// kernel: tpu_custom_call.1
= control target key start
LH: loop header
LB: loop body
LE: loop exit
PB: predicated region body
PF: predicated region fallthrough
CT: control target
= control target key end

     0   :  { %10 = vsyncpa [#allocation4], 0  ;;  %s774_s0 = inlined_call_operand.hbm [shape: f32[16,128], index: 0, kind: input, shape index: {}]   ;;  %s775_s1 = inlined_call_operand.hbm [shape: f32[128,128], index: 1, kind: input, shape index: {}]   ;;  %s776_s2 = inlined_call_operand.hbm [shape: f32[1,128], index: 2, kind: input, shape index: {}]   ;;  %s777_s3 = inlined_call_operand.hbm [shape: f32[128,128], index: 3, kind: input, shape index: {}]   ;;  %s778_s4 = inlined_call_operand.hbm [shape: f32[1,128], index: 4, kind: input, shape index: {}]   ;;  %s779_s5 = inlined_call_operand.hbm [shape: f32[16,128], index: 5, kind: output, shape index: {}]  }
   0x1   :  { %11 = vsyncpa [#allocation7], 0 }
   0x2   :  { %12 = vsyncpa [#allocation10], 0 }
   0x3   :  { %13 = vsyncpa [#allocation5], 0  ;;  %s645_s18 = smov [#allocation6]   ;;  %s646_s20 = smov [#allocation9]  }
   0x4   :  { %s31_s19 = sshll.u32 %s645_s18, 4  ;;  %s53_s21 = sshll.u32 %s646_s20, 4  ;;  %s32_s19 = int_to_ptr.vmem [resolvable:$true] %s31_s19  ;;  %s683_s21 = int_to_ptr.vmem [resolvable:$true] %s53_s21 }
   0x5   :  { %s505_s24 = scalar_lea.hbm %s775_s1, 2048 }
   0x6   :  { %p506_p0 = scmp.ne.s32.totalorder %s775_s1, %s505_s24  ;;  %p509_p1 = scmp.lt.u32.totalorder %s505_s24, %s775_s1 }
   0x8   :  { %p511_p2 = pnand %p509_p1, %p506_p0 }
   0xa   :  { %514 = shalt.err (!%p511_p2)
}
   0xb   :  { %s515_s29 = scalar_lea.vmem %s32_s19, 2048  ;;  %p520_p4 = scmp.lt.s32.totalorder %s32_s19, %s32_s19 }
   0xc   :  { %p516_p3 = scmp.ne.s32.totalorder %s32_s19, %s515_s29  ;;  %p521_p5 = scmp.lt.s32.totalorder %s515_s29, %s515_s29 }
   0xe   :  { %p522_p6 = por %p521_p5, %p520_p4 }
  0x10   :  { %p523_p7 = pnand %p522_p6, %p516_p3 }
  0x12   :  { %526 = shalt.err (!%p523_p7)
}
  0x13   :  { %s647_s30 = smov 128   ;;  %s648_s6 = smov 8  }
  0x14   :  { %37 = dma.hbm_to_vmem [thread:$0]  %s775_s1, 2048, %s32_s19, [#allocation7], %s647_s30, %s647_s30, %s648_s6  }
  0x15   :  { %s527_s11 = scalar_lea.hbm %s777_s3, 2048 }
  0x16   :  { %p528_p8 = scmp.ne.s32.totalorder %s777_s3, %s527_s11  ;;  %p531_p9 = scmp.lt.u32.totalorder %s527_s11, %s777_s3 }
  0x18   :  { %p533_p10 = pnand %p531_p9, %p528_p8 }
  0x1a   :  { %536 = shalt.err (!%p533_p10)
}
  0x1b   :  { %s537_s16 = scalar_lea.vmem %s683_s21, 2048  ;;  %p542_p12 = scmp.lt.s32.totalorder %s683_s21, %s683_s21 }
  0x1c   :  { %p538_p11 = scmp.ne.s32.totalorder %s683_s21, %s537_s16  ;;  %p543_p13 = scmp.lt.s32.totalorder %s537_s16, %s537_s16 }
  0x1e   :  { %p544_p0 = por %p543_p13, %p542_p12 }
  0x20   :  { %p545_p1 = pnand %p544_p0, %p538_p11 }
  0x22   :  { %548 = shalt.err (!%p545_p1)
}
  0x23   :  { %59 = dma.hbm_to_vmem [thread:$0]  %s777_s3, 2048, %s683_s21, [#allocation10], %s647_s30, %s647_s30, %s648_s6  }
  0x24   :  { %s649_s18 = smov [#allocation3]   ;;  %s650_s20 = smov [#allocation8]  }
  0x25   :  { %s19_s19 = sshll.u32 %s649_s18, 4  ;;  %s44_s22 = sshll.u32 %s650_s20, 4  ;;  %s20_s19 = int_to_ptr.vmem [resolvable:$true] %s19_s19  ;;  %s45_s22 = int_to_ptr.vmem [resolvable:$true] %s44_s22 }
  0x26   :  { %s549_s25 = scalar_lea.hbm %s774_s0, 256 }
  0x27   :  { %p550_p2 = scmp.ne.s32.totalorder %s774_s0, %s549_s25  ;;  %p553_p3 = scmp.lt.u32.totalorder %s549_s25, %s774_s0 }
  0x29   :  { %p555_p4 = pnand %p553_p3, %p550_p2 }
  0x2b   :  { %558 = shalt.err (!%p555_p4)
}
  0x2c   :  { %s559_s3 = scalar_lea.vmem %s20_s19, 256  ;;  %p564_p6 = scmp.lt.s32.totalorder %s20_s19, %s20_s19 }
  0x2d   :  { %p560_p5 = scmp.ne.s32.totalorder %s20_s19, %s559_s3  ;;  %p565_p7 = scmp.lt.s32.totalorder %s559_s3, %s559_s3 }
  0x2f   :  { %p566_p8 = por %p565_p7, %p564_p6 }
  0x31   :  { %p567_p9 = pnand %p566_p8, %p560_p5 }
  0x33   :  { %570 = shalt.err (!%p567_p9)
}
  0x34   :  { %25 = dma.hbm_to_vmem [thread:$0]  %s774_s0, 256, %s20_s19, [#allocation4], %s647_s30, %s647_s30, %s648_s6  }
  0x35   :  { %s571_s10 = scalar_lea.hbm %s776_s2, 16 }
  0x36   :  { %p572_p10 = scmp.ne.s32.totalorder %s776_s2, %s571_s10  ;;  %p575_p11 = scmp.lt.u32.totalorder %s571_s10, %s776_s2 }
  0x38   :  { %p577_p12 = pnand %p575_p11, %p572_p10 }
  0x3a   :  { %580 = shalt.err (!%p577_p12)
}
  0x3b   :  { %s581_s15 = scalar_lea.vmem %s45_s22, 16  ;;  %s585_s16 = scalar_lea.vmem %s45_s22, 32 }
  0x3c   :  { %p582_p13 = scmp.ne.s32.totalorder %s45_s22, %s581_s15  ;;  %p586_p0 = scmp.lt.s32.totalorder %s45_s22, %s45_s22 }
  0x3d   :  { %p587_p1 = scmp.lt.s32.totalorder %s585_s16, %s581_s15 }
  0x3f   :  { %p588_p2 = por %p587_p1, %p586_p0 }
  0x41   :  { %p589_p3 = pnand %p588_p2, %p582_p13 }
  0x43   :  { %592 = shalt.err (!%p589_p3)
}
  0x44   :  { %47 = dma.hbm_to_vmem [thread:$0]  %s776_s2, 16, %s45_s22, [#allocation7]  }
  0x45   :  { %s651_s17 = smov [#allocation11]   ;;  %s593_s23 = scalar_lea.hbm %s778_s4, 16 }
  0x46   :  { %s66_s18 = sshll.u32 %s651_s17, 4  ;;  %p594_p4 = scmp.ne.s32.totalorder %s778_s4, %s593_s23  ;;  %s67_s18 = int_to_ptr.vmem [resolvable:$true] %s66_s18 }
  0x47   :  { %p597_p5 = scmp.lt.u32.totalorder %s593_s23, %s778_s4 }
  0x49   :  { %p599_p6 = pnand %p597_p5, %p594_p4 }
  0x4b   :  { %602 = shalt.err (!%p599_p6)
}
  0x4c   :  { %s603_s28 = scalar_lea.vmem %s67_s18, 16  ;;  %s607_s2 = scalar_lea.vmem %s67_s18, 32 }
  0x4d   :  { %p604_p7 = scmp.ne.s32.totalorder %s67_s18, %s603_s28  ;;  %p608_p8 = scmp.lt.s32.totalorder %s67_s18, %s67_s18 }
  0x4e   :  { %p609_p9 = scmp.lt.s32.totalorder %s607_s2, %s603_s28 }
  0x50   :  { %p610_p10 = por %p609_p9, %p608_p8 }
  0x52   :  { %p611_p11 = pnand %p610_p10, %p604_p7 }
  0x54   :  { %614 = shalt.err (!%p611_p11)
}
  0x55   :  { %69 = dma.hbm_to_vmem [thread:$0]  %s778_s4, 16, %s67_s18, [#allocation10]  }
  0x56   :  { %637 = dma.done.wait [#allocation4], 256  }
  0x57   :  { %638 = vsyncadd [#allocation4], 4294967040 }
  0x58   :  { %639 = dma.done.wait [#allocation7], 2064  }
  0x59   :  { %640 = vsyncadd [#allocation7], 4294965232 }
  0x5a   :  { %641 = dma.done.wait [#allocation10], 2064  }
  0x5b   :  { %642 = vsyncadd [#allocation10], 4294965232  ;;  %v93_v0 = vld [vmem:[#allocation6] sm:$0xff]  ;;  %v94_v1 = vld [vmem:[#allocation6 + $0x8] sm:$0xff]  ;;  %s652_s4 = smov [#allocation12]  }
  0x5c   :  { %v95_v2 = vld [vmem:[#allocation6 + $0x10] sm:$0xff]  ;;  %v433_v3 = vpack.c.bf16 %v94_v1, %v93_v0  ;;  %v96_v4 = vld [vmem:[#allocation6 + $0x18] sm:$0xff]  ;;  %v97_v6 = vld [vmem:[#allocation6 + $0x20] sm:$0xff]  ;;  %s311_s3 = sshll.u32 %s652_s4, 4  ;;  %s312_s3 = int_to_ptr.vmem [resolvable:$true] %s311_s3 }
  0x5d   :  { %v437_v5 = vpack.c.bf16 %v96_v4, %v95_v2  ;;  %v98_v7 = vld [vmem:[#allocation6 + $0x28] sm:$0xff]  ;;  %v99_v9 = vld [vmem:[#allocation6 + $0x30] sm:$0xff]  ;;  %v100_v10 = vld [vmem:[#allocation6 + $0x38] sm:$0xff]  ;;  %s615_s21 = scalar_lea.vmem %s312_s3, 256  ;;  %p620_p13 = scmp.lt.s32.totalorder %s312_s3, %s312_s3 }
  0x5e   :  { %434 = vmatprep.subr.bf16.mxu0 %v433_v3  ;;  %v441_v8 = vpack.c.bf16 %v98_v7, %v97_v6  ;;  %v91_v11 = vld [vmem:[#allocation3] sm:$0xff]  ;;  %v195_v12 = vld [vmem:[#allocation9] sm:$0xff]  ;;  %v198_v16 = vld [vmem:[#allocation9 + $0x18] sm:$0xff]  ;;  %v445_v20 = vpack.c.bf16 %v100_v10, %v99_v9  ;;  %p616_p12 = scmp.ne.s32.totalorder %s312_s3, %s615_s21  ;;  %p621_p0 = scmp.lt.s32.totalorder %s615_s21, %s615_s21 }
  0x5f   :  { %436 = vmatpush3.bf16.msra.mxu0 %v433_v3  ;;  %395 = vmatprep.mubr.f32.mxu0 %v91_v11  ;;  %v196_v13 = vld [vmem:[#allocation9 + $0x8] sm:$0xff]  ;;  %v197_v14 = vld [vmem:[#allocation9 + $0x10] sm:$0xff]  ;;  %v199_v18 = vld [vmem:[#allocation9 + $0x20] sm:$0xff] }
  0x60   :  { %438 = vmatprep.subr.bf16.mxu0 %v437_v5  ;;  %v465_v15 = vpack.c.bf16 %v196_v13, %v195_v12  ;;  %v469_v17 = vpack.c.bf16 %v198_v16, %v197_v14  ;;  %v200_v19 = vld [vmem:[#allocation9 + $0x28] sm:$0xff]  ;;  %v101_v21 = vld [vmem:[#allocation6 + $0x40] sm:$0xff]  ;;  %v201_v24 = vld [vmem:[#allocation9 + $0x30] sm:$0xff]  ;;  %p622_p1 = por %p621_p0, %p620_p13 }
  0x61   :  { %v102_v22 = vld [vmem:[#allocation6 + $0x48] sm:$0xff]  ;;  %v473_v23 = vpack.c.bf16 %v200_v19, %v199_v18  ;;  %v202_v25 = vld [vmem:[#allocation9 + $0x38] sm:$0xff]  ;;  %v103_v27 = vld [vmem:[#allocation6 + $0x50] sm:$0xff] }
  0x62   :  { %466 = vmatprep.subr.bf16.mxu1 %v465_v15  ;;  %v449_v26 = vpack.c.bf16 %v102_v22, %v101_v21  ;;  %v104_v28 = vld [vmem:[#allocation6 + $0x58] sm:$0xff]  ;;  %v477_v29 = vpack.c.bf16 %v202_v25, %v201_v24  ;;  %v203_v30 = vld [vmem:[#allocation9 + $0x40] sm:$0xff]  ;;  %v204_v31 = vld [vmem:[#allocation9 + $0x48] sm:$0xff]  ;;  %p623_p2 = pnand %p622_p1, %p616_p12 }
  0x63   :  { %440 = vmatpush3.bf16.msra.mxu0 %v437_v5  ;;  %468 = vmatpush3.bf16.msra.mxu1 %v465_v15  ;;  %v453_v32 = vpack.c.bf16 %v104_v28, %v103_v27  ;;  %v105_v33 = vld [vmem:[#allocation6 + $0x60] sm:$0xff]  ;;  %v106_v34 = vld [vmem:[#allocation6 + $0x68] sm:$0xff]  ;;  %v481_v35 = vpack.c.bf16 %v204_v31, %v203_v30  ;;  %v205_v36 = vld [vmem:[#allocation9 + $0x50] sm:$0xff] }
  0x64   :  { %442 = vmatprep.subr.bf16.mxu0 %v441_v8  ;;  %470 = vmatprep.subr.bf16.mxu1 %v469_v17  ;;  %v206_v37 = vld [vmem:[#allocation9 + $0x58] sm:$0xff]  ;;  %v457_v38 = vpack.c.bf16 %v106_v34, %v105_v33  ;;  %v107_v39 = vld [vmem:[#allocation6 + $0x70] sm:$0xff]  ;;  %v207_v42 = vld [vmem:[#allocation9 + $0x60] sm:$0xff] }
  0x65   :  { %v108_v40 = vld [vmem:[#allocation6 + $0x78] sm:$0xff]  ;;  %v485_v41 = vpack.c.bf16 %v206_v37, %v205_v36  ;;  %v208_v43 = vld [vmem:[#allocation9 + $0x68] sm:$0xff]  ;;  %v325_v50 = vld [vmem:[#allocation8] ss:$0 sm:$0xff] }
  0x66   :  { %v461_v44 = vpack.c.bf16 %v108_v40, %v107_v39  ;;  %v489_v45 = vpack.c.bf16 %v208_v43, %v207_v42  ;;  %v92_v46 = vld [vmem:[#allocation3 + $0x8] sm:$0xff]  ;;  %v326_v57 = vld [vmem:[#allocation11] ss:$0 sm:$0xff] }
  0x67   :  { %444 = vmatpush3.bf16.msra.mxu0 %v441_v8  ;;  %472 = vmatpush3.bf16.msra.mxu1 %v469_v17  ;;  %v209_v47 = vld [vmem:[#allocation9 + $0x70] sm:$0xff]  ;;  %v210_v48 = vld [vmem:[#allocation9 + $0x78] sm:$0xff] }
  0x68   :  { %446 = vmatprep.subr.bf16.mxu0 %v445_v20  ;;  %474 = vmatprep.subr.bf16.mxu1 %v473_v23  ;;  %v493_v49 = vpack.c.bf16 %v210_v48, %v209_v47 }
  0x6b   :  { %448 = vmatpush3.bf16.msra.mxu0 %v445_v20  ;;  %476 = vmatpush3.bf16.msra.mxu1 %v473_v23 }
  0x6c   :  { %450 = vmatprep.subr.bf16.mxu0 %v449_v26  ;;  %478 = vmatprep.subr.bf16.mxu1 %v477_v29 }
  0x6f   :  { %452 = vmatpush3.bf16.msra.mxu0 %v449_v26  ;;  %480 = vmatpush3.bf16.msra.mxu1 %v477_v29 }
  0x70   :  { %454 = vmatprep.subr.bf16.mxu0 %v453_v32  ;;  %482 = vmatprep.subr.bf16.mxu1 %v481_v35 }
  0x73   :  { %456 = vmatpush3.bf16.msra.mxu0 %v453_v32  ;;  %484 = vmatpush3.bf16.msra.mxu1 %v481_v35 }
  0x74   :  { %458 = vmatprep.subr.bf16.mxu0 %v457_v38  ;;  %486 = vmatprep.subr.bf16.mxu1 %v485_v41 }
  0x77   :  { %460 = vmatpush3.bf16.msra.mxu0 %v457_v38  ;;  %488 = vmatpush3.bf16.msra.mxu1 %v485_v41 }
  0x78   :  { %462 = vmatprep.subr.bf16.mxu0 %v461_v44  ;;  %490 = vmatprep.subr.bf16.mxu1 %v489_v45 }
  0x7b   :  { %464 = vmatpush3.bf16.msra.mxu0 %v461_v44  ;;  %492 = vmatpush3.bf16.msra.mxu1 %v489_v45 }
  0x7c   :  { %494 = vmatprep.subr.bf16.mxu1 %v493_v49 }
  0x7e   :  { %396 = vmatmul.mubr.f32.vlgmr.msra.gmra.mrb[0].mxu0 %v92_v46 }
  0x7f   :  { %496 = vmatpush3.bf16.msra.mxu1 %v493_v49 }
 0x151   :  { %v397_v51 = vpop.f32.mrb[0].mxu0 }
 0x152   :  { %v188_v52 = vadd.f32 %v397_v51, %v325_v50  ;;  %v182_v53 = vpop.f32.mrb[1].mxu0 }
 0x153   :  { %v183_v54 = vadd.f32 %v325_v50, %v182_v53 }
 0x154   :  { %v192_v56 = vmax.f32 %v188_v52, 0.0 }
 0x155   :  { %v191_v55 = vmax.f32 %v183_v54, 0.0 }
 0x157   :  { %430 = vmatprep.mubr.f32.mxu1 %v191_v55 }
 0x158   :  { %431 = vmatmul.mubr.f32.vlgmr.msra.gmra.mrb[0].mxu1 %v192_v56 }
 0x22b   :  { %v432_v58 = vpop.f32.mrb[0].mxu1 }
 0x22c   :  { %v303_v59 = vadd.f32 %v432_v58, %v326_v57  ;;  %v277_v60 = vpop.f32.mrb[1].mxu1 }
 0x22d   :  { %v302_v61 = vadd.f32 %v326_v57, %v277_v60 }
 0x22e   :  { %305 = vst [vmem:[#allocation12 + $0x8] sm:$0xff] %v303_v59 }
 0x22f   :  { %304 = vst [vmem:[#allocation12] sm:$0xff] %v302_v61 }
 0x230   :  { %626 = shalt.err (!%p623_p2)
}
 0x231   :  { %s627_s9 = scalar_lea.hbm %s779_s5, 256 }
 0x232   :  { %p628_p3 = scmp.ne.s32.totalorder %s779_s5, %s627_s9  ;;  %p631_p4 = scmp.lt.u32.totalorder %s627_s9, %s779_s5 }
 0x234   :  { %p633_p5 = pnand %p631_p4, %p628_p3 }
 0x236   :  { %636 = shalt.err (!%p633_p5)
}
 0x237   :  { %317 = dma.vmem_to_hbm [thread:$0]  %s312_s3, 256, %s779_s5, [#allocation5], %s647_s30, %s647_s30, %s648_s6  }
 0x238   :  { %643 = dma.done.wait [#allocation5], 256  }
 0x239   :  { %644 = vsyncadd [#allocation5], 4294967040 }
 0x23a   :  { %321 = vsyncpa [#allocation4], 1 }
 0x23b   :  { %322 = vsyncpa [#allocation7], 1 }
 0x23c   :  { %323 = vsyncpa [#allocation10], 1 }
 0x23d   :  { %324 = vsyncpa [#allocation5], 1 }

</bundles_post_ra>
